<compile_context>
chip_gen: v7x
topology: tpu7x:2x2x1
jax: 0.10.0
libtpu: 0.0.40
codegen_flags: <defaults>
</compile_context>

<pallas_src>
import math

import jax
import jax.numpy as jnp
from jax.experimental import pallas as pl
from jax.experimental.pallas import tpu as pltpu


def _round_up(x, m):
    return (x + m - 1) // m * m


def _lora_kernel(x_ref, worg_ref, bias_ref, wd_ref, wu_ref, o_ref):
    # grid = (Mp // tm, Np // tn); both axes are independent ("parallel"), so
    # the N axis can shard across v7x's two TensorCores even when Mp // tm == 1.
    x = x_ref[...]
    # org_linear: x_tile @ W_org^T panel, f32 MXU accumulation.
    org = jnp.dot(x, worg_ref[...], preferred_element_type=jnp.float32)
    # lora_down: recomputed per (i, j) step (rank is tiny) -> no scratch carry.
    lx = jnp.dot(x, wd_ref[...], preferred_element_type=jnp.float32)
    # lora_up: coef (= multiplier * alpha / lora_dim) pre-folded into wu on the
    # host; lx cast to the wu dtype (bf16 by default) for the rank-K dot.
    lup = jnp.dot(lx.astype(wu_ref.dtype), wu_ref[...],
                  preferred_element_type=jnp.float32)
    o_ref[...] = (org + bias_ref[...] + lup).astype(o_ref.dtype)


def lora_forward(x, w_org, b_org, w_down, w_up, *, multiplier, alpha, lora_dim,
                 tile_m=512, tile_n=512, compute_dtype=jnp.bfloat16):
    """x: (B, S, in_dim). Weights in PyTorch layout:
       w_org: (out, in), b_org: (out,), w_down: (lora_dim, in), w_up: (out, lora_dim).
       compute_dtype: dtype of the matmul operand streams (default bf16);
       accumulation is always f32, bias add is f32, output keeps x.dtype."""
    B, S, in_dim = x.shape
    out_dim = w_org.shape[0]
    coef = float(multiplier) * (float(alpha) / float(lora_dim))
    out_dtype = x.dtype
    cdt = jnp.dtype(compute_dtype)
    cs = cdt.itemsize
    osz = jnp.dtype(out_dtype).itemsize

    # ---- tile selection -------------------------------------------------------
    # packed sublane multiple (f32:8, bf16:16, int8/fp8:32) for clean vreg
    # layout / unmasked stores on both the compute and output dtypes.
    sub = max(8 * (4 // cs), 8 * (4 // osz))
    M = B * S
    tm = min(tile_m, _round_up(M, sub))
    if out_dim <= tile_n:
        tn = out_dim                      # full-extent block (no 128 constraint)
    else:
        tn = tile_n                       # multiple of 128 by construction

    def _footprint(tm_, tn_):
        # double-buffered VMEM bytes for all pipelined operands (+ lane/sublane
        # padding for the rank-sized dims).
        ld_lane = _round_up(lora_dim, 128)
        ld_sub = _round_up(lora_dim, sub)
        b = 0
        b += 2 * tm_ * in_dim * cs          # x tile
        b += 2 * in_dim * tn_ * cs          # W_org^T panel
        b += 2 * 8 * tn_ * 4                # bias panel (sublane padded, f32)
        b += 2 * in_dim * ld_lane * cs      # W_down^T (lane padded)
        b += 2 * ld_sub * tn_ * cs          # coef * W_up^T panel
        b += 2 * tm_ * tn_ * osz            # output tile
        return b

    budget = 40 * 1024 * 1024               # leaves headroom under v7x's 64 MiB
    while _footprint(tm, tn) > budget and tn > 128 and tn % 256 == 0:
        tn //= 2
    while _footprint(tm, tn) > budget and tm > sub:
        tm = max(sub, _round_up(tm // 2, sub))
    fp = _footprint(tm, tn)
    vmem_limit = int(min(max(fp + 8 * 1024 * 1024, 32 * 1024 * 1024),
                         48 * 1024 * 1024))

    # ---- padding --------------------------------------------------------------
    Mp = _round_up(M, tm)
    Np = _round_up(out_dim, tn)
    x2 = x.reshape(M, in_dim)
    if Mp != M:
        x2 = jnp.pad(x2, ((0, Mp - M), (0, 0)))
    x2 = x2.astype(cdt)

    # ---- weight prep (host-side, static): transpose to (in, out) layouts ------
    worg_t = w_org.T.astype(cdt)                    # (in, out)
    wd_t = w_down.T.astype(cdt)                     # (in, lora_dim)
    wu_t = (w_up.T.astype(jnp.float32) * coef).astype(cdt)   # (lora_dim, out)
    bias2 = b_org.reshape(1, out_dim).astype(jnp.float32)
    if Np != out_dim:
        worg_t = jnp.pad(worg_t, ((0, 0), (0, Np - out_dim)))
        wu_t = jnp.pad(wu_t, ((0, 0), (0, Np - out_dim)))
        bias2 = jnp.pad(bias2, ((0, 0), (0, Np - out_dim)))

    grid = (Mp // tm, Np // tn)
    n_row_tiles = Mp // tm

    cost = pl.CostEstimate(
        flops=(2 * Mp * in_dim * Np
               + 2 * Mp * in_dim * lora_dim * (Np // tn)   # lx recomputed per j
               + 2 * Mp * lora_dim * Np),
        transcendentals=0,
        bytes_accessed=(Mp * in_dim * cs                    # x: once per row tile
                        + n_row_tiles * in_dim * Np * cs    # W_org re-streamed
                        + in_dim * lora_dim * cs            # W_down: once
                        + n_row_tiles * lora_dim * Np * cs  # W_up re-streamed
                        + n_row_tiles * Np * 4              # bias re-streamed
                        + Mp * Np * osz),                   # output
    )

    out2 = pl.pallas_call(
        _lora_kernel,
        out_shape=jax.ShapeDtypeStruct((Mp, Np), out_dtype),
        grid_spec=pltpu.PrefetchScalarGridSpec(
            num_scalar_prefetch=0,
            grid=grid,
            in_specs=[
                pl.BlockSpec((tm, in_dim), lambda i, j: (i, 0)),        # x tile
                pl.BlockSpec((in_dim, tn), lambda i, j: (0, j)),        # W_org^T panel
                pl.BlockSpec((1, tn), lambda i, j: (0, j)),             # bias panel
                pl.BlockSpec((in_dim, lora_dim), lambda i, j: (0, 0)),  # W_down^T
                pl.BlockSpec((lora_dim, tn), lambda i, j: (0, j)),      # coef*W_up^T panel
            ],
            out_specs=pl.BlockSpec((tm, tn), lambda i, j: (i, j)),
        ),
        compiler_params=pltpu.CompilerParams(
            dimension_semantics=("parallel", "parallel"),
            vmem_limit_bytes=vmem_limit,
        ),
        cost_estimate=cost,
    )(x2, worg_t, bias2, wd_t, wu_t)

    # TODO(synk): optional pl.Buffered(3) on the W_org panel for v7x (near the
    # compute/DMA crossover) and a large-M mode that streams x instead of W_org.
    return out2[:M, :out_dim].reshape(B, S, out_dim)


def lora_forward_ref(x, w_org, b_org, w_down, w_up, *, multiplier, alpha, lora_dim):
    scale = alpha / lora_dim
    org = jnp.einsum("bsi,oi->bso", x, w_org) + b_org
    lx = jnp.einsum("bsi,ri->bsr", x, w_down)
    lup = jnp.einsum("bsr,or->bso", lx, w_up)
    return org + lup * multiplier * scale


def _make_params(key, in_dim, out_dim, lora_dim):
    k_worg, k_b, k_down, k_up = jax.random.split(key, 4)
    w_org = jax.random.normal(k_worg, (out_dim, in_dim), dtype=jnp.float32) * 0.05
    b_org = jax.random.normal(k_b, (out_dim,), dtype=jnp.float32) * 0.01
    # lora_down: kaiming_uniform_(a=sqrt(5)) -> U(-1/sqrt(fan_in), 1/sqrt(fan_in))
    bound = 1.0 / math.sqrt(in_dim)
    w_down = jax.random.uniform(k_down, (lora_dim, in_dim), dtype=jnp.float32,
                                minval=-bound, maxval=bound)
    # __init__ zero-inits lora_up; use small nonzero values so the LoRA branch
    # is actually exercised in the test.
    w_up = jax.random.normal(k_up, (out_dim, lora_dim), dtype=jnp.float32) * 0.02
    return w_org, b_org, w_down, w_up


if __name__ == "__main__":
    key = jax.random.PRNGKey(0)
    k1, k2, k3, k4, k5, k6 = jax.random.split(key, 6)
    multiplier, alpha = 1.0, 1.0

    # Test 1: tiny shapes, explicit f32 compute path (tight tolerance).
    B, S, in_dim, out_dim, lora_dim = 2, 8, 32, 32, 4
    x = jax.random.normal(k1, (B, S, in_dim), dtype=jnp.float32)
    w_org, b_org, w_down, w_up = _make_params(k2, in_dim, out_dim, lora_dim)
    out = jax.block_until_ready(
        lora_forward(x, w_org, b_org, w_down, w_up,
                     multiplier=multiplier, alpha=alpha, lora_dim=lora_dim,
                     compute_dtype=jnp.float32))
    ref = lora_forward_ref(x, w_org, b_org, w_down, w_up,
                           multiplier=multiplier, alpha=alpha, lora_dim=lora_dim)
    assert out.shape == (B, S, out_dim)
    assert jnp.allclose(out, ref, atol=1e-4, rtol=1e-4), "mismatch vs reference (test 1)"

    # Test 2: default bf16 compute path; exercises M padding (M=80 -> tm=64,
    # pad to 128), N tiling (out_dim=256, tile_n=128 -> 2 column panels) and
    # per-step lx recompute.  Loosened tolerance for bf16 operands.
    B, S, in_dim, out_dim, lora_dim = 2, 40, 128, 256, 4
    x = jax.random.normal(k3, (B, S, in_dim), dtype=jnp.float32)
    w_org, b_org, w_down, w_up = _make_params(k4, in_dim, out_dim, lora_dim)
    out = jax.block_until_ready(
        lora_forward(x, w_org, b_org, w_down, w_up,
                     multiplier=multiplier, alpha=alpha, lora_dim=lora_dim,
                     tile_m=64, tile_n=128))
    ref = lora_forward_ref(x, w_org, b_org, w_down, w_up,
                           multiplier=multiplier, alpha=alpha, lora_dim=lora_dim)
    assert out.shape == (B, S, out_dim)
    assert jnp.allclose(out, ref, atol=3e-2, rtol=3e-2), "mismatch vs reference (test 2)"

    # Test 3: default tile sizes / default bf16 (single grid step, full-extent
    # N block), modest shapes to keep runtime small.
    B, S, in_dim, out_dim, lora_dim = 1, 256, 256, 512, 8
    x = jax.random.normal(k5, (B, S, in_dim), dtype=jnp.float32)
    w_org, b_org, w_down, w_up = _make_params(k6, in_dim, out_dim, lora_dim)
    out = jax.block_until_ready(
        lora_forward(x, w_org, b_org, w_down, w_up,
                     multiplier=multiplier, alpha=alpha, lora_dim=lora_dim))
    ref = lora_forward_ref(x, w_org, b_org, w_down, w_up,
                           multiplier=multiplier, alpha=alpha, lora_dim=lora_dim)
    assert out.shape == (B, S, out_dim)
    assert jnp.allclose(out, ref, atol=3e-2, rtol=3e-2), "mismatch vs reference (test 3)"

    # TODO(synk): Conv2d org_module variant, split_dims (split qkv) and
    # training-only paths (dropout / rank_dropout / module_dropout / GGPO
    # perturbation) are not implemented; eval-mode Linear forward only.
    # TODO(synk): add a K (in_dim) grid axis with a pl.when-finalized f32
    # accumulator for in_dim panels too large for VMEM (not needed at FLUX dims).
    print("KERNEL_OK")
</pallas_src>

<mosaic_0001>
module attributes {stable_mosaic.version = 11 : i64} {
  func.func @_lora_kernel(%arg0: i32, %arg1: i32, %arg2: memref<16x32xf32, #tpu.memory_space<vmem>>, %arg3: memref<32x32xf32, #tpu.memory_space<vmem>>, %arg4: memref<1x32xf32, #tpu.memory_space<vmem>>, %arg5: memref<32x4xf32, #tpu.memory_space<vmem>>, %arg6: memref<4x32xf32, #tpu.memory_space<vmem>>, %arg7: memref<16x32xf32, #tpu.memory_space<vmem>>) attributes {dimension_semantics = [#tpu.dimension_semantics<parallel>, #tpu.dimension_semantics<parallel>], iteration_bounds = array<i64: 1, 1>, scalar_prefetch = 0 : i64, scratch_operands = 0 : i64, tpu.core_type = #tpu.core_type<tc>, window_params = [{transform_indices = @transform_0, window_bounds = array<i64: 16, 32>}, {transform_indices = @transform_1, window_bounds = array<i64: 32, 32>}, {transform_indices = @transform_2, window_bounds = array<i64: 1, 32>}, {pipeline_mode = #tpu.pipeline_mode<synchronous>, transform_indices = @transform_3, window_bounds = array<i64: 32, 4>}, {transform_indices = @transform_4, window_bounds = array<i64: 4, 32>}, {transform_indices = @transform_5, window_bounds = array<i64: 16, 32>}]} {
    %c0 = arith.constant 0 : index
    %c0_0 = arith.constant 0 : index
    %0 = vector.load %arg2[%c0, %c0_0] : memref<16x32xf32, #tpu.memory_space<vmem>>, vector<16x32xf32>
    %c0_1 = arith.constant 0 : index
    %c0_2 = arith.constant 0 : index
    %1 = vector.load %arg3[%c0_1, %c0_2] : memref<32x32xf32, #tpu.memory_space<vmem>>, vector<32x32xf32>
    %cst = arith.constant dense<0.000000e+00> : vector<16x32xf32>
    %2 = tpu.matmul %0, %1, %cst {dimension_numbers = #tpu.dot_dimension_numbers<[1], [0], [0], [1], [0, 0, 1, 1], [], []>} : vector<16x32xf32>, vector<32x32xf32>, vector<16x32xf32> -> vector<16x32xf32>
    %c0_3 = arith.constant 0 : index
    %c0_4 = arith.constant 0 : index
    %3 = vector.load %arg5[%c0_3, %c0_4] : memref<32x4xf32, #tpu.memory_space<vmem>>, vector<32x4xf32>
    %cst_5 = arith.constant dense<0.000000e+00> : vector<16x4xf32>
    %4 = tpu.matmul %0, %3, %cst_5 {dimension_numbers = #tpu.dot_dimension_numbers<[1], [0], [0], [1], [0, 0, 1, 1], [], []>} : vector<16x32xf32>, vector<32x4xf32>, vector<16x4xf32> -> vector<16x4xf32>
    %c0_6 = arith.constant 0 : index
    %c0_7 = arith.constant 0 : index
    %5 = vector.load %arg6[%c0_6, %c0_7] : memref<4x32xf32, #tpu.memory_space<vmem>>, vector<4x32xf32>
    %cst_8 = arith.constant dense<0.000000e+00> : vector<16x32xf32>
    %6 = tpu.matmul %4, %5, %cst_8 {dimension_numbers = #tpu.dot_dimension_numbers<[1], [0], [0], [1], [0, 0, 1, 1], [], []>} : vector<16x4xf32>, vector<4x32xf32>, vector<16x32xf32> -> vector<16x32xf32>
    %c0_9 = arith.constant 0 : index
    %c0_10 = arith.constant 0 : index
    %7 = vector.load %arg4[%c0_9, %c0_10] : memref<1x32xf32, #tpu.memory_space<vmem>>, vector<1x32xf32>
    %8 = vector.broadcast %7 : vector<1x32xf32> to vector<16x32xf32>
    %9 = arith.addf %2, %8 : vector<16x32xf32>
    %10 = arith.addf %9, %6 : vector<16x32xf32>
    %c0_11 = arith.constant 0 : index
    %c0_12 = arith.constant 0 : index
    %11 = vector.load %arg7[%c0_11, %c0_12] : memref<16x32xf32, #tpu.memory_space<vmem>>, vector<16x32xf32>
    tpu.vector_store %arg7[%c0_11, %c0_12], %10 {strides = array<i32>} : memref<16x32xf32, #tpu.memory_space<vmem>>, vector<16x32xf32>,
    return
  }
  func.func @transform_0(%arg0: i32, %arg1: i32) -> (i32, i32) {
    %c0_i32 = arith.constant 0 : i32
    %c0_i32_0 = arith.constant 0 : i32
    return %arg0, %c0_i32 : i32, i32
  }
  func.func @transform_1(%arg0: i32, %arg1: i32) -> (i32, i32) {
    %c0_i32 = arith.constant 0 : i32
    %c0_i32_0 = arith.constant 0 : i32
    return %c0_i32, %arg1 : i32, i32
  }
  func.func @transform_2(%arg0: i32, %arg1: i32) -> (i32, i32) {
    %c0_i32 = arith.constant 0 : i32
    %c0_i32_0 = arith.constant 0 : i32
    return %c0_i32, %arg1 : i32, i32
  }
  func.func @transform_3(%arg0: i32, %arg1: i32) -> (i32, i32) {
    %c0_i32 = arith.constant 0 : i32
    %c0_i32_0 = arith.constant 0 : i32
    %c0_i32_1 = arith.constant 0 : i32
    return %c0_i32, %c0_i32_0 : i32, i32
  }
  func.func @transform_4(%arg0: i32, %arg1: i32) -> (i32, i32) {
    %c0_i32 = arith.constant 0 : i32
    %c0_i32_0 = arith.constant 0 : i32
    return %c0_i32, %arg1 : i32, i32
  }
  func.func @transform_5(%arg0: i32, %arg1: i32) -> (i32, i32) {
    %c0_i32 = arith.constant 0 : i32
    return %arg0, %arg1 : i32, i32
  }
}

</mosaic_0001>

<bundles_post_ra>
// kernel: tpu_custom_call.1
= control target key start
LH: loop header
LB: loop body
LE: loop exit
PB: predicated region body
PF: predicated region fallthrough
CT: control target
= control target key end

     0   :  { %10 = vsyncpa [#allocation3], 0  ;;  %s539_s0 = inlined_call_operand.hbm [shape: f32[16,32], index: 0, kind: input, shape index: {}]   ;;  %s540_s1 = inlined_call_operand.vmem [shape: f32[32,32], index: 1, kind: input, shape index: {}]   ;;  %s541_s2 = inlined_call_operand.vmem [shape: f32[1,32], index: 2, kind: input, shape index: {}]   ;;  %s542_s3 = inlined_call_operand.vmem [shape: f32[32,4], index: 3, kind: input, shape index: {}]   ;;  %s543_s4 = inlined_call_operand.vmem [shape: f32[4,32], index: 4, kind: input, shape index: {}]   ;;  %s544_s5 = inlined_call_operand.hbm [shape: f32[16,32], index: 5, kind: output, shape index: {}]  }
   0x1   :  { %11 = vsyncpa [#allocation4], 0  ;;  %s439_s18 = smov [#allocation2]   ;;  %s391_s22 = scalar_lea.hbm %s539_s0, 256 }
   0x2   :  { %s17_s19 = sshll.u32 %s439_s18, 4  ;;  %p392_p0 = scmp.ne.s32.totalorder %s539_s0, %s391_s22  ;;  %s18_s19 = int_to_ptr.vmem [resolvable:$true] %s17_s19 }
   0x3   :  { %p395_p1 = scmp.lt.u32.totalorder %s391_s22, %s539_s0 }
   0x5   :  { %p397_p2 = pnand %p395_p1, %p392_p0 }
   0x7   :  { %400 = shalt.err (!%p397_p2)
}
   0x8   :  { %s401_s27 = scalar_lea.vmem %s18_s19, 256  ;;  %p406_p4 = scmp.lt.s32.totalorder %s18_s19, %s18_s19 }
   0x9   :  { %p402_p3 = scmp.ne.s32.totalorder %s18_s19, %s401_s27  ;;  %p407_p5 = scmp.lt.s32.totalorder %s401_s27, %s401_s27 }
   0xb   :  { %p408_p6 = por %p407_p5, %p406_p4 }
   0xd   :  { %p409_p7 = pnand %p408_p6, %p402_p3 }
   0xf   :  { %412 = shalt.err (!%p409_p7)
}
  0x10   :  { %s440_s28 = smov 128   ;;  %s441_s29 = smov 8  }
  0x11   :  { %23 = dma.hbm_to_vmem [thread:$0]  %s539_s0, 256, %s18_s19, [#allocation3], %s440_s28, %s440_s28, %s441_s29  }
  0x12   :  { %435 = dma.done.wait [#allocation3], 256  }
  0x13   :  { %436 = vsyncadd [#allocation3], 4294967040  ;;  %vm45_vm0 = vcmask 261120   ;;  %v41_v0 = vld [vmem:[%s542_s3] sm:$0xff]  ;;  %v42_v1 = vld [vmem:[%s542_s3 + $0x8] sm:$0xff]  ;;  %vm135_vm1 = vcmask 1043456  }
  0x14   :  { %v43_v2 = vld [vmem:[%s542_s3 + $0x10] sm:$0xff]  ;;  %v367_v3 = vpack.c.bf16 %v42_v1, %v41_v0  ;;  %v44_v4 = vld [vmem:[%s542_s3 + $0x18] sm:$0xff]  ;;  %v35_v5 = vld [vmem:[#allocation2] sm:$0xff]  ;;  %vm128_vm2 = vcmask 31744   ;;  %s442_s24 = smov [#allocation5]  }
  0x15   :  { %v371_v6 = vpack.c.bf16 %v44_v4, %v43_v2  ;;  %348 = vmatprep.mubr.msk.f32.mxu0 %vm45_vm0, %v35_v5  ;;  %v36_v7 = vld [vmem:[#allocation2 + $0x8] sm:$0xff]  ;;  %v127_v8 = vld [vmem:[%s543_s4] sm:$0xf]  ;;  %v39_v12 = vld [vmem:[%s540_s1 + $0x10] sm:$0xff]  ;;  %s305_s25 = sshll.u32 %s442_s24, 4  ;;  %s306_s25 = int_to_ptr.vmem [resolvable:$true] %s305_s25 }
  0x16   :  { %368 = vmatprep.subr.bf16.mxu0 %v367_v3  ;;  %v37_v9 = vld [vmem:[%s540_s1] sm:$0xff]  ;;  %v38_v10 = vld [vmem:[%s540_s1 + $0x8] sm:$0xff]  ;;  %351 = vmatprep.subr.msk.mxu1 %vm135_vm1, %v127_v8  ;;  %v40_v13 = vld [vmem:[%s540_s1 + $0x18] sm:$0xff]  ;;  %s413_s1 = scalar_lea.vmem %s306_s25, 256  ;;  %p418_p9 = scmp.lt.s32.totalorder %s306_s25, %s306_s25 }
  0x17   :  { %370 = vmatpush3.bf16.msra.mxu0 %v367_v3  ;;  %v375_v11 = vpack.c.bf16 %v38_v10, %v37_v9  ;;  %352 = vmatpush3.msk.msra.mxu1 %vm135_vm1, %v127_v8  ;;  %v379_v16 = vpack.c.bf16 %v40_v13, %v39_v12  ;;  %v322_v17 = vld [vmem:[%s541_s2] ss:$0 sm:$0xff]  ;;  %p414_p8 = scmp.ne.s32.totalorder %s306_s25, %s413_s1  ;;  %p419_p10 = scmp.lt.s32.totalorder %s413_s1, %s413_s1 }
  0x18   :  { %372 = vmatprep.subr.bf16.mxu0 %v371_v6 }
  0x19   :  { %376 = vmatprep.subr.bf16.mxu1 %v375_v11  ;;  %p420_p11 = por %p419_p10, %p418_p9 }
  0x1b   :  { %374 = vmatpush3.bf16.msra.mxu0 %v371_v6  ;;  %p421_p12 = pnand %p420_p11, %p414_p8 }
  0x1e   :  { %349 = vmatmul.mubr.msk.f32.vlgmr.msra.gmra.mrb[0].mxu0 %vm45_vm0, %v36_v7 }
  0xf1   :  { %v350_v14 = vpop.f32.mrb[0].mxu0 }
  0xf2   :  { %v118_v15 = vpop.f32.mrb[1].mxu0 }
  0xf3   :  { %353 = vmatprep.mubr.msk.f32.mxu1 %vm128_vm2, %v118_v15 }
  0xf4   :  { %354 = vmatmul.mubr.msk.f32.vlgmr.msra.gmra.mrb[0].mxu1 %vm128_vm2, %v350_v14 }
  0xf5   :  { %378 = vmatpush3.bf16.msra.mxu1 %v375_v11  ;;  %364 = vmatprep.mubr.msk.f32.mxu1 %vm45_vm0, %v35_v5 }
  0xf6   :  { %380 = vmatprep.subr.bf16.mxu1 %v379_v16 }
  0xf9   :  { %382 = vmatpush3.bf16.msra.mxu1 %v379_v16 }
  0xfc   :  { %365 = vmatmul.mubr.msk.f32.vlgmr.msra.gmra.mrb[0].mxu1 %vm45_vm0, %v36_v7 }
 0x1cf   :  { %v366_v18 = vpop.f32.mrb[0].mxu1 }
 0x1d0   :  { %v293_v19 = vadd.f32 %v366_v18, %v322_v17  ;;  %v287_v20 = vpop.f32.mrb[1].mxu1 }
 0x1d1   :  { %v288_v21 = vadd.f32 %v322_v17, %v287_v20 }
 0x1d2   :  { %299 = vst.msk [vmem:[#allocation5 + $0x8] sm:$0xff] %vm45_vm0, %v293_v19 }
 0x1d3   :  { %298 = vst.msk [vmem:[#allocation5] sm:$0xff] %vm45_vm0, %v288_v21 }
 0x1d4   :  { %424 = shalt.err (!%p421_p12)
}
 0x1d5   :  { %s425_s27 = scalar_lea.hbm %s544_s5, 256 }
 0x1d6   :  { %p426_p13 = scmp.ne.s32.totalorder %s544_s5, %s425_s27  ;;  %p429_p0 = scmp.lt.u32.totalorder %s425_s27, %s544_s5 }
 0x1d8   :  { %p431_p1 = pnand %p429_p0, %p426_p13 }
 0x1da   :  { %434 = shalt.err (!%p431_p1)
}
 0x1db   :  { %311 = dma.vmem_to_hbm [thread:$0]  %s306_s25, 256, %s544_s5, [#allocation4], %s440_s28, %s440_s28, %s441_s29  }
 0x1dc   :  { %437 = dma.done.wait [#allocation4], 256  }
 0x1dd   :  { %438 = vsyncadd [#allocation4], 4294967040 }
 0x1de   :  { %315 = vsyncpa [#allocation3], 1 }
 0x1df   :  { %316 = vsyncpa [#allocation4], 1 }

</bundles_post_ra>
